<compile_context>
chip_gen: v7x
topology: tpu7x:2x2x1
jax: 0.10.0
libtpu: 0.0.40
codegen_flags: <defaults>
</compile_context>

<pallas_src>
import numpy as np
import jax
import jax.numpy as jnp
from jax.experimental import pallas as pl
from jax.experimental.pallas import tpu as pltpu


def _shuffle_indices(in_channels, groups=2):
    """Replicates ChannelShuffle.__init__ index construction."""
    group_len = in_channels // groups
    out_channels = (
        np.arange(in_channels).reshape(groups, group_len).transpose(1, 0).flatten()
    )
    return out_channels[:group_len], out_channels[group_len:], group_len


def _pick_hw_tile(hw, c_half, itemsize, target_bytes=1 << 20,
                  max_lanes=2048, min_lanes=512):
    """Lane-tile along H*W.

    Returns either the full HW extent (always a legal block last-dim) or a
    128-multiple tile sized so one step reads ~target_bytes from HBM
    (2 inputs x 2 channel halves x c_half sublanes per lane).
    """
    per_lane_bytes = 2 * 2 * c_half * itemsize        # read side per lane position
    lanes = target_bytes // max(per_lane_bytes, 1)
    lanes = max(min(lanes, max_lanes), min_lanes)
    lanes = (lanes // 128) * 128
    lanes = max(lanes, 128)
    if lanes >= hw:
        return hw                                      # single full-width tile
    return lanes                                       # 128-multiple tile, cdiv grid


def _channel_shuffle_kernel(x1_ref, x2_ref, o1_ref, o2_ref):
    # x1_ref / x2_ref : (1, 2, c_half, hw_tile)   dim 1 = low / high channel half
    # o1_ref / o2_ref : (1, c_half, 2, hw_tile)   dim 2 = even / odd interleave slot
    o1_ref[:, :, 0, :] = x1_ref[:, 0, :, :]
    o1_ref[:, :, 1, :] = x2_ref[:, 0, :, :]
    o2_ref[:, :, 0, :] = x1_ref[:, 1, :, :]
    o2_ref[:, :, 1, :] = x2_ref[:, 1, :, :]


def channel_shuffle_pallas(x1, x2, groups=2):
    """ChannelShuffle(in_channels=2*C1, groups=2, split_shuffle=True) forward."""
    assert groups == 2, "Only group=2 is implemented (as in the reference module)."
    assert x1.shape == x2.shape and x1.dtype == x2.dtype
    N, C1, H, W = x1.shape
    in_channels = 2 * C1
    fp1, fp2, _ = _shuffle_indices(in_channels, groups)

    # The kernel relies on the closed-form interleave above; verify it matches the
    # module's index construction (requires an even per-branch channel count).
    assert C1 % 2 == 0, "kernel assumes an even per-branch channel count (true in ShuffleNetV2)"
    c_half = C1 // 2
    expected1 = np.stack([np.arange(c_half), C1 + np.arange(c_half)], axis=1).ravel()
    expected2 = np.stack(
        [c_half + np.arange(c_half), C1 + c_half + np.arange(c_half)], axis=1
    ).ravel()
    assert np.array_equal(fp1, expected1) and np.array_equal(fp2, expected2)

    HW = H * W
    itemsize = np.dtype(x1.dtype).itemsize
    hw_tile = _pick_hw_tile(HW, c_half, itemsize)
    num_hw = pl.cdiv(HW, hw_tile)

    # Free (row-major) reshapes:
    #   inputs  -> (N, 2, c_half, HW): channel halves become an explicit axis, so
    #              the gather lives entirely in the input BlockSpec / DMA.
    #   outputs -> (N, c_half, 2, HW): the even/odd interleave is a row-major
    #              reshape of (N, C1, HW), so the kernel body is four bulk,
    #              lane-dense block stores.
    x1v = x1.reshape(N, 2, c_half, HW)
    x2v = x2.reshape(N, 2, c_half, HW)

    in_spec = pl.BlockSpec((1, 2, c_half, hw_tile), lambda n, h: (n, 0, 0, h))
    out_spec = pl.BlockSpec((1, c_half, 2, hw_tile), lambda n, h: (n, 0, 0, h))

    total_bytes = 4 * N * C1 * HW * itemsize  # read every element once, write once

    o1v, o2v = pl.pallas_call(
        _channel_shuffle_kernel,
        out_shape=(
            jax.ShapeDtypeStruct((N, c_half, 2, HW), x1.dtype),
            jax.ShapeDtypeStruct((N, c_half, 2, HW), x1.dtype),
        ),
        grid=(N, num_hw),
        in_specs=[in_spec, in_spec],
        out_specs=(out_spec, out_spec),
        compiler_params=pltpu.CompilerParams(
            # every grid step writes a disjoint output block -> both axes can be
            # sharded across TensorCores (helps v7x at small batch sizes).
            dimension_semantics=("parallel", "parallel")
        ),
        cost_estimate=pl.CostEstimate(
            flops=0, transcendentals=0, bytes_accessed=total_bytes
        ),
    )(x1v, x2v)

    return o1v.reshape(N, C1, H, W), o2v.reshape(N, C1, H, W)


def channel_shuffle_ref(x1, x2, groups=2):
    """Pure-JAX reference mirroring the PyTorch forward."""
    x = jnp.concatenate([x1, x2], axis=1)
    C = x.shape[1]
    gl = C // groups
    idx = np.arange(C).reshape(groups, gl).transpose(1, 0).flatten()
    return x[:, idx[:gl]], x[:, idx[gl:]]


if __name__ == "__main__":
    key = jax.random.PRNGKey(0)
    k1, k2 = jax.random.split(key)
    N, C1, H, W = 2, 4, 16, 16
    x1 = jax.random.normal(k1, (N, C1, H, W), dtype=jnp.float32)
    x2 = jax.random.normal(k2, (N, C1, H, W), dtype=jnp.float32)

    out1, out2 = channel_shuffle_pallas(x1, x2)
    jax.block_until_ready(out1)
    jax.block_until_ready(out2)

    ref1, ref2 = channel_shuffle_ref(x1, x2)
    np.testing.assert_allclose(np.asarray(out1), np.asarray(ref1), rtol=0, atol=0)
    np.testing.assert_allclose(np.asarray(out2), np.asarray(ref2), rtol=0, atol=0)
    assert out1.shape == (N, C1, H, W) and out2.shape == (N, C1, H, W)

    print("KERNEL_OK")
</pallas_src>

<mosaic_0001>
module attributes {stable_mosaic.version = 11 : i64} {
  func.func @_channel_shuffle_kernel(%arg0: i32, %arg1: i32, %arg2: memref<1x2x2x256xf32, #tpu.memory_space<vmem>>, %arg3: memref<1x2x2x256xf32, #tpu.memory_space<vmem>>, %arg4: memref<1x2x2x256xf32, #tpu.memory_space<vmem>>, %arg5: memref<1x2x2x256xf32, #tpu.memory_space<vmem>>) attributes {dimension_semantics = [#tpu.dimension_semantics<parallel>, #tpu.dimension_semantics<parallel>], iteration_bounds = array<i64: 2, 1>, scalar_prefetch = 0 : i64, scratch_operands = 0 : i64, tpu.core_type = #tpu.core_type<tc>, window_params = [{transform_indices = @transform_0, window_bounds = array<i64: 1, 2, 2, 256>}, {transform_indices = @transform_1, window_bounds = array<i64: 1, 2, 2, 256>}, {transform_indices = @transform_2, window_bounds = array<i64: 1, 2, 2, 256>}, {transform_indices = @transform_3, window_bounds = array<i64: 1, 2, 2, 256>}]} {
    %c0 = arith.constant 0 : index
    %c0_0 = arith.constant 0 : index
    %c0_1 = arith.constant 0 : index
    %c0_2 = arith.constant 0 : index
    %0 = vector.load %arg2[%c0, %c0_0, %c0_1, %c0_2] : memref<1x2x2x256xf32, #tpu.memory_space<vmem>>, vector<1x1x2x256xf32>
    %1 = vector.shape_cast %0 : vector<1x1x2x256xf32> to vector<1x2x256xf32>
    %c0_3 = arith.constant 0 : index
    %c0_4 = arith.constant 0 : index
    %c0_5 = arith.constant 0 : index
    %c0_6 = arith.constant 0 : index
    %2 = vector.load %arg4[%c0_3, %c0_4, %c0_5, %c0_6] : memref<1x2x2x256xf32, #tpu.memory_space<vmem>>, vector<1x2x1x256xf32>
    %3 = vector.shape_cast %2 : vector<1x2x1x256xf32> to vector<1x2x256xf32>
    %4 = vector.shape_cast %1 : vector<1x2x256xf32> to vector<1x2x1x256xf32>
    tpu.vector_store %arg4[%c0_3, %c0_4, %c0_5, %c0_6], %4 {strides = array<i32>} : memref<1x2x2x256xf32, #tpu.memory_space<vmem>>, vector<1x2x1x256xf32>,
    %c0_7 = arith.constant 0 : index
    %c0_8 = arith.constant 0 : index
    %c0_9 = arith.constant 0 : index
    %c0_10 = arith.constant 0 : index
    %5 = vector.load %arg3[%c0_7, %c0_8, %c0_9, %c0_10] : memref<1x2x2x256xf32, #tpu.memory_space<vmem>>, vector<1x1x2x256xf32>
    %6 = vector.shape_cast %5 : vector<1x1x2x256xf32> to vector<1x2x256xf32>
    %c0_11 = arith.constant 0 : index
    %c0_12 = arith.constant 0 : index
    %c1 = arith.constant 1 : index
    %c0_13 = arith.constant 0 : index
    %7 = vector.load %arg4[%c0_11, %c0_12, %c1, %c0_13] : memref<1x2x2x256xf32, #tpu.memory_space<vmem>>, vector<1x2x1x256xf32>
    %8 = vector.shape_cast %7 : vector<1x2x1x256xf32> to vector<1x2x256xf32>
    %9 = vector.shape_cast %6 : vector<1x2x256xf32> to vector<1x2x1x256xf32>
    tpu.vector_store %arg4[%c0_11, %c0_12, %c1, %c0_13], %9 {strides = array<i32>} : memref<1x2x2x256xf32, #tpu.memory_space<vmem>>, vector<1x2x1x256xf32>,
    %c0_14 = arith.constant 0 : index
    %c1_15 = arith.constant 1 : index
    %c0_16 = arith.constant 0 : index
    %c0_17 = arith.constant 0 : index
    %10 = vector.load %arg2[%c0_14, %c1_15, %c0_16, %c0_17] : memref<1x2x2x256xf32, #tpu.memory_space<vmem>>, vector<1x1x2x256xf32>
    %11 = vector.shape_cast %10 : vector<1x1x2x256xf32> to vector<1x2x256xf32>
    %c0_18 = arith.constant 0 : index
    %c0_19 = arith.constant 0 : index
    %c0_20 = arith.constant 0 : index
    %c0_21 = arith.constant 0 : index
    %12 = vector.load %arg5[%c0_18, %c0_19, %c0_20, %c0_21] : memref<1x2x2x256xf32, #tpu.memory_space<vmem>>, vector<1x2x1x256xf32>
    %13 = vector.shape_cast %12 : vector<1x2x1x256xf32> to vector<1x2x256xf32>
    %14 = vector.shape_cast %11 : vector<1x2x256xf32> to vector<1x2x1x256xf32>
    tpu.vector_store %arg5[%c0_18, %c0_19, %c0_20, %c0_21], %14 {strides = array<i32>} : memref<1x2x2x256xf32, #tpu.memory_space<vmem>>, vector<1x2x1x256xf32>,
    %c0_22 = arith.constant 0 : index
    %c1_23 = arith.constant 1 : index
    %c0_24 = arith.constant 0 : index
    %c0_25 = arith.constant 0 : index
    %15 = vector.load %arg3[%c0_22, %c1_23, %c0_24, %c0_25] : memref<1x2x2x256xf32, #tpu.memory_space<vmem>>, vector<1x1x2x256xf32>
    %16 = vector.shape_cast %15 : vector<1x1x2x256xf32> to vector<1x2x256xf32>
    %c0_26 = arith.constant 0 : index
    %c0_27 = arith.constant 0 : index
    %c1_28 = arith.constant 1 : index
    %c0_29 = arith.constant 0 : index
    %17 = vector.load %arg5[%c0_26, %c0_27, %c1_28, %c0_29] : memref<1x2x2x256xf32, #tpu.memory_space<vmem>>, vector<1x2x1x256xf32>
    %18 = vector.shape_cast %17 : vector<1x2x1x256xf32> to vector<1x2x256xf32>
    %19 = vector.shape_cast %16 : vector<1x2x256xf32> to vector<1x2x1x256xf32>
    tpu.vector_store %arg5[%c0_26, %c0_27, %c1_28, %c0_29], %19 {strides = array<i32>} : memref<1x2x2x256xf32, #tpu.memory_space<vmem>>, vector<1x2x1x256xf32>,
    return
  }
  func.func @transform_0(%arg0: i32, %arg1: i32) -> (i32, i32, i32, i32) {
    %c0_i32 = arith.constant 0 : i32
    %c0_i32_0 = arith.constant 0 : i32
    %c0_i32_1 = arith.constant 0 : i32
    return %arg0, %c0_i32, %c0_i32_0, %arg1 : i32, i32, i32, i32
  }
  func.func @transform_1(%arg0: i32, %arg1: i32) -> (i32, i32, i32, i32) {
    %c0_i32 = arith.constant 0 : i32
    %c0_i32_0 = arith.constant 0 : i32
    %c0_i32_1 = arith.constant 0 : i32
    return %arg0, %c0_i32, %c0_i32_0, %arg1 : i32, i32, i32, i32
  }
  func.func @transform_2(%arg0: i32, %arg1: i32) -> (i32, i32, i32, i32) {
    %c0_i32 = arith.constant 0 : i32
    %c0_i32_0 = arith.constant 0 : i32
    %c0_i32_1 = arith.constant 0 : i32
    return %arg0, %c0_i32, %c0_i32_0, %arg1 : i32, i32, i32, i32
  }
  func.func @transform_3(%arg0: i32, %arg1: i32) -> (i32, i32, i32, i32) {
    %c0_i32 = arith.constant 0 : i32
    %c0_i32_0 = arith.constant 0 : i32
    %c0_i32_1 = arith.constant 0 : i32
    return %arg0, %c0_i32, %c0_i32_0, %arg1 : i32, i32, i32, i32
  }
}

</mosaic_0001>

<bundles_post_ra>
// kernel: tpu_custom_call.1
= control target key start
LH: loop header
LB: loop body
LE: loop exit
PB: predicated region body
PF: predicated region fallthrough
CT: control target
= control target key end

     0   :  { %9 = vsyncpa [#allocation3], 0  ;;  %s1152_s0 = inlined_call_operand.hbm [shape: f32[2,2,2,256], index: 0, kind: input, shape index: {}]   ;;  %s1153_s1 = inlined_call_operand.hbm [shape: f32[2,2,2,256], index: 1, kind: input, shape index: {}]   ;;  %s1154_s2 = inlined_call_operand.hbm [shape: f32[2,2,2,256], index: 2, kind: output, shape index: {0}]   ;;  %s1155_s3 = inlined_call_operand.hbm [shape: f32[2,2,2,256], index: 3, kind: output, shape index: {1}]  }
   0x1   :  { %11 = vsyncpa [#allocation3 + $0x1], 0 }
   0x2   :  { %12 = vsyncpa [#allocation6], 0 }
   0x3   :  { %14 = vsyncpa [#allocation6 + $0x1], 0 }
   0x4   :  { %15 = vsyncpa [#allocation4], 0 }
   0x5   :  { %17 = vsyncpa [#allocation4 + $0x1], 0 }
   0x6   :  { %18 = vsyncpa [#allocation9], 0 }
   0x7   :  { %20 = vsyncpa [#allocation9 + $0x1], 0  ;;  %s846_s12 = smov 0   ;;  %s848_s13 = smov 0  }
   0x8   :  { %s850_s14 = smov 0   ;;  %s852_s15 = smov 0  }
   0x9   :  { %s854_s16 = smov 0   ;;  %s856_s17 = smov 0  }
   0xa LB: > { %s523_s18 = sadd.s32 4294967295, %s816_s17   ;;  %s524_s19 = sadd.s32 4294967294, %s816_s17   ;;  %s816_s17 = sphi %s856_s17, %s26_s17   ;;  %s812_s16 = sphi %s854_s16, %s1175_s16   ;;  %s808_s15 = sphi %s852_s15, %s1174_s15   ;;  %s804_s14 = sphi %s850_s14, %s1173_s14   ;;  %s800_s13 = sphi %s848_s13, %s1172_s13   ;;  %s796_s12 = sphi %s846_s12, %s1171_s12  }
   0xb   : > { %s38_s20 = sadd.s32 1, %s812_s16  ;;  %s47_s21 = sadd.s32 1, %s804_s14 }
   0xc   : > { %p40_p0 = scmp.ge.s32.totalorder %s38_s20, 2  ;;  %p54_p1 = scmp.ne.s32.totalorder %s804_s14, %s800_s13 }
   0xd   : > { %p55_p2 = scmp.eq.s32.totalorder %s816_s17, 0  ;;  %p60_p3 = scmp.ne.s32.totalorder %s800_s13, %s796_s12 }
   0xe   : > { %s1177_s20 = smov (%p40_p0, %s38_s20), 0  ;;  %p61_p5 = scmp.eq.s32.totalorder %s523_s18, 0 }
   0xf   : > { %p887_p4 = por %p55_p2, %p54_p1  ;;  %s42_s23 = ssub.s32 %s812_s16, %s1177_s20 }
  0x10   : > { %p114_p6 = scmp.eq.s32.totalorder %s523_s18, 1  ;;  %p45_p7 = scmp.eq.s32.totalorder %s42_s23, 0 }
  0x11   : > { %p893_p8 = por %p61_p5, %p60_p3  ;;  %p120_p10 = scmp.eq.s32.totalorder %s524_s19, 1 }
  0x12   : > { %p897_p9 = por %p114_p6, %p54_p1  ;;  %p584_p13 = scmp.lt.s32.totalorder %s816_s17, 2 }
  0x13   : > { %s1159_s24 = scalar_select %p893_p8, 1, 0 }
  0x14   : > { %s1160_s25 = scalar_select %p897_p9, 1, 0 }
  0x15   : > { %s902_s26 = scalar_select %p45_p7, %s804_s14, %s47_s21  }
  0x16   : > { %p904_p11 = por %p120_p10, %p60_p3  ;;  %s911_s28 = sand.u32 1, %s804_s14  }
  0x17   : > { %s527_s29 = sshll.u32 %s911_s28, 3  ;;  %s558_s30 = sshll.u32 %s812_s16, 7 }
  0x18   : > { %s1161_s27 = scalar_select %p904_p11, 1, 0 }
  0x19   : > { %s920_s6 = scalar_lea.hbm %s1152_s0, %s558_s30  ;;  %s172_s7 = scalar_lea.vmem [#allocation2], %s527_s29 }
  0x1a   : > { %s181_s8 = sshll.u32 %s172_s7, 4  ;;  %p928_p0 = pnand %p584_p13, %p887_p4  ;;  %s924_s8 = int_to_ptr.vmem [resolvable:$true] %s181_s8 }
  0x1b   : > { %s169_s10 = scalar_lea.sflag [#allocation3], %s911_s28  ;;  %s638_s11 = scalar_lea.hbm %s920_s6, 128 }
  0x1c   : > { %p639_p2 = scmp.ne.s32.totalorder %s920_s6, %s638_s11  ;;  %p640_p3 = pneg %p928_p0 }
  0x1d   : > { %s643_s21 = scalar_lea.hbm %s1152_s0, 256  ;;  %p644_p4 = scmp.lt.u32.totalorder %s920_s6, %s1152_s0 }
  0x1e   : > { %p641_p5 = pnand %p640_p3, %p639_p2  ;;  %p645_p7 = scmp.lt.u32.totalorder %s643_s21, %s638_s11 }
  0x1f   : > { %p647_p13 = scmp.lt.u32.totalorder %s638_s11, %s920_s6 }
  0x20   : > { %p642_p6 = pneg %p641_p5  ;;  %p646_p10 = por %p645_p7, %p644_p4 }
  0x22   : > { %p648_p12 = por %p647_p13, %p646_p10 }
  0x24   : > { %p649_p1 = pnand %p648_p12, %p642_p6 }
  0x26   : > { %652 = shalt.err (!%p649_p1)
}
  0x27   : > { %s653_s4 = scalar_lea.vmem %s924_s8, 128  ;;  %s818_s5 = smov [#allocation2]  }
  0x28   : > { %p654_p2 = scmp.ne.s32.totalorder %s924_s8, %s653_s4  ;;  %s658_s7 = sshll.u32 %s818_s5, 4  ;;  %s659_s7 = int_to_ptr.vmem [resolvable:$false] %s658_s7 }
  0x29   : > { %s660_s18 = scalar_lea.vmem %s659_s7, 256  ;;  %p661_p9 = scmp.lt.s32.totalorder %s924_s8, %s659_s7 }
  0x2a   : > { %p656_p5 = pnand %p654_p2, %p640_p3  ;;  %p662_p4 = scmp.lt.s32.totalorder %s660_s18, %s653_s4 }
  0x2c   : > { %p657_p11 = pneg %p656_p5  ;;  %p663_p7 = por %p662_p4, %p661_p9 }
  0x2e   : > { %p664_p10 = pnand %p663_p7, %p657_p11 }
  0x30   : > { %667 = shalt.err (!%p664_p10)
}
  0x31   : > { %s819_s11 = smov 64   ;;  %s820_s19 = smov 4  }
  0x32   : > { %573 = dma.hbm_to_vmem [thread:$0]  (!%p928_p0), %s920_s6, 128, %s924_s8, %s169_s10, %s819_s11, %s819_s11, %s820_s19  }
  0x33   : > { %p212_p9 = scmp.lt.s32.totalorder %s816_s17, 3  ;;  %s970_s23 = scalar_lea.hbm %s1153_s1, %s558_s30 }
  0x34   : > { %p1163_p11 = scmp.ge.s32.totalorder %s816_s17, 1  ;;  %s195_s5 = scalar_lea.vmem [#allocation5], %s527_s29 }
  0x35   : > { %s204_s7 = sshll.u32 %s195_s5, 4  ;;  %s192_s6 = scalar_lea.sflag [#allocation6], %s911_s28  ;;  %s980_s7 = int_to_ptr.vmem [resolvable:$true] %s204_s7 }
  0x36   : > { %p974_p12 = pnand %p1163_p11, %p212_p9  ;;  %s668_s8 = scalar_lea.hbm %s970_s23, 128 }
  0x37   : > { %p669_p1 = scmp.ne.s32.totalorder %s970_s23, %s668_s8  ;;  %s673_s18 = scalar_lea.hbm %s1153_s1, 256 }
  0x38   : > { %p674_p2 = scmp.lt.u32.totalorder %s970_s23, %s1153_s1  ;;  %p675_p5 = scmp.lt.u32.totalorder %s673_s18, %s668_s8 }
  0x39   : > { %p671_p6 = pnand %p669_p1, %p640_p3  ;;  %p677_p7 = scmp.lt.u32.totalorder %s668_s8, %s970_s23 }
  0x3a   : > { %p676_p4 = por %p675_p5, %p674_p2 }
  0x3b   : > { %p672_p13 = pneg %p671_p6 }
  0x3c   : > { %p678_p10 = por %p677_p7, %p676_p4 }
  0x3e   : > { %p679_p9 = pnand %p678_p10, %p672_p13 }
  0x40   : > { %682 = shalt.err (!%p679_p9)
}
  0x41   : > { %s683_s29 = scalar_lea.vmem %s980_s7, 128  ;;  %s821_s5 = smov [#allocation5]  }
  0x42   : > { %p684_p11 = scmp.ne.s32.totalorder %s980_s7, %s683_s29  ;;  %s688_s30 = sshll.u32 %s821_s5, 4  ;;  %s689_s30 = int_to_ptr.vmem [resolvable:$false] %s688_s30 }
  0x43   : > { %s690_s10 = scalar_lea.vmem %s689_s30, 256  ;;  %p691_p8 = scmp.lt.s32.totalorder %s980_s7, %s689_s30 }
  0x44   : > { %p686_p1 = pnand %p684_p11, %p640_p3  ;;  %p692_p2 = scmp.lt.s32.totalorder %s690_s10, %s683_s29 }
  0x46   : > { %p687_p6 = pneg %p686_p1  ;;  %p693_p5 = por %p692_p2, %p691_p8 }
  0x48   : > { %p694_p4 = pnand %p693_p5, %p687_p6 }
  0x4a   : > { %697 = shalt.err (!%p694_p4)
}
  0x4b   : > { %576 = dma.hbm_to_vmem [thread:$0]  (!%p928_p0), %s970_s23, 128, %s980_s7, %s192_s6, %s819_s11, %s819_s11, %s820_s19  }
  0x4c   : > { %216 = sbr.rel (%p974_p12) target bundleno = 139 (0x8b), region = 28  ;;  %s1014_s8 = sand.u32 (!%p974_p12), 1, %s800_s13  }
  0x4d   : > { %s1017_s18 = sshll.u32 (!%p974_p12), %s1014_s8, 3  ;;  %s219_s9 = scalar_lea.sflag (!%p974_p12), [#allocation3], %s1014_s8 }
  0x4e   : > { %s222_s21 = scalar_lea.vmem (!%p974_p12), [#allocation2], %s1017_s18  ;;  %p1165_p8 = scmp.ne.s32.totalorder (!%p974_p12), %s1159_s24, 0 }
  0x53   : > { %779 = dma.done.wait (%p1165_p8), %s219_s9, 128  }
  0x54   : > { %781 = vsyncadd (%p1165_p8), %s219_s9, 4294967168  ;;  %s228_s28 = scalar_lea.sflag [#allocation6], %s1014_s8  ;;  %s231_s11 = scalar_lea.vmem [#allocation5], %s1017_s18 }
  0x55   : > { %783 = dma.done.wait (%p1165_p8), %s228_s28, 128  }
  0x56   : > { %785 = vsyncadd (%p1165_p8), %s228_s28, 4294967168  ;;  %v280_v0 = vlaneseq  ;;  %s256_s19 = scalar_lea.vmem [#allocation7], %s1017_s18  ;;  %s560_s4 = sshll.u32 %s808_s15, 7 }
  0x57   : > { %s357_s23 = sshll.u32 %s256_s19, 4  ;;  %v538_v2 = vld.sshfl [vmem:[%s222_s21] sm:$0x33 pattern:$0x75316420]  ;;  %s1040_s7 = scalar_lea.vmem [#allocation8], %s1017_s18  ;;  %s1037_s23 = int_to_ptr.vmem [resolvable:$true] %s357_s23 }
  0x58   : > { %vm1032_vm0 = vcmp.lt.s32.totalorder %v280_v0, 256  ;;  %s375_s24 = sshll.u32 %s1040_s7, 4  ;;  %v277_v3 = vcombine.high %v538_v2, %v538_v2  ;;  %v540_v4 = vld.sshfl [vmem:[%s231_s11] sm:$0x33 pattern:$0x75316420]  ;;  %s1048_s15 = scalar_lea.hbm %s1154_s2, %s560_s4  ;;  %s1057_s24 = int_to_ptr.vmem [resolvable:$true] %s375_s24 }
  0x59   : > { %284 = vst.msk [vmem:[%s256_s19] ss:$2 sm:$0x3] %vm1032_vm0, %v538_v2  ;;  %v296_v5 = vcombine.high %v540_v4, %v540_v4  ;;  %541 = vst.msk [vmem:[%s256_s19 + $0x1] ss:$2 sm:$0x3] %vm1032_vm0, %v540_v4  ;;  %s1067_s30 = scalar_lea.hbm %s1155_s3, %s560_s4 }
  0x5a   : > { %v544_v6 = vld.sshfl [vmem:[%s222_s21 + $0x4] sm:$0x33 pattern:$0x75316420]  ;;  %s337_s10 = scalar_lea.sflag [#allocation4], %s1014_s8  ;;  %s698_s18 = scalar_lea.vmem %s1037_s23, 128 }
  0x5b   : > { %539 = vst.msk [vmem:[%s256_s19 + $0x4] ss:$2 sm:$0x3] %vm1032_vm0, %v277_v3  ;;  %v313_v7 = vcombine.high %v544_v6, %v544_v6  ;;  %316 = vst.msk [vmem:[%s1040_s7] ss:$2 sm:$0x3] %vm1032_vm0, %v544_v6  ;;  %p699_p0 = scmp.ne.s32.totalorder %s1037_s23, %s698_s18 }
  0x5c   : > { %v547_v8 = vld.sshfl [vmem:[%s231_s11 + $0x4] sm:$0x33 pattern:$0x75316420]  ;;  %p1168_p3 = scmp.ne.s32.totalorder %s1160_s25, 0  ;;  %s822_s9 = smov [#allocation7]  }
  0x5d   : > { %542 = vst.msk [vmem:[%s256_s19 + $0x5] ss:$2 sm:$0x3] %vm1032_vm0, %v296_v5  ;;  %v329_v9 = vcombine.high %v547_v8, %v547_v8  ;;  %548 = vst.msk [vmem:[%s1040_s7 + $0x1] ss:$2 sm:$0x3] %vm1032_vm0, %v547_v8 }
  0x5e   : > { %545 = vst.msk [vmem:[%s1040_s7 + $0x4] ss:$2 sm:$0x3] %vm1032_vm0, %v313_v7  ;;  %p700_p12 = pnand %p699_p0, %p1168_p3  ;;  %s702_s21 = sshll.u32 %s822_s9, 4  ;;  %s703_s21 = int_to_ptr.vmem [resolvable:$false] %s702_s21 }
  0x5f   : > { %s704_s28 = scalar_lea.vmem %s703_s21, 256  ;;  %p705_p7 = scmp.lt.s32.totalorder %s1037_s23, %s703_s21 }
  0x60   : > { %p701_p13 = pneg %p700_p12  ;;  %p706_p10 = scmp.lt.s32.totalorder %s704_s28, %s698_s18 }
  0x62   : > { %p707_p9 = por %p706_p10, %p705_p7 }
  0x64   : > { %p708_p11 = pnand %p707_p9, %p701_p13 }
  0x66   : > { %711 = shalt.err (!%p708_p11)
}
  0x67   : > { %s712_s11 = scalar_lea.hbm %s1048_s15, 128  ;;  %s716_s6 = scalar_lea.hbm %s1154_s2, 256 }
  0x68   : > { %p713_p1 = scmp.ne.s32.totalorder %s1048_s15, %s712_s11  ;;  %p717_p5 = scmp.lt.u32.totalorder %s1048_s15, %s1154_s2 }
  0x69   : > { %p718_p4 = scmp.lt.u32.totalorder %s716_s6, %s712_s11  ;;  %p720_p0 = scmp.lt.u32.totalorder %s712_s11, %s1048_s15 }
  0x6a   : > { %p714_p6 = pnand %p713_p1, %p1168_p3 }
  0x6b   : > { %p719_p8 = por %p718_p4, %p717_p5 }
  0x6c   : > { %p715_p2 = pneg %p714_p6 }
  0x6d   : > { %p721_p12 = por %p720_p0, %p719_p8 }
  0x6f   : > { %p722_p13 = pnand %p721_p12, %p715_p2 }
  0x71   : > { %725 = shalt.err (!%p722_p13)
}
  0x72   : > { %s823_s5 = smov 64   ;;  %s824_s18 = smov 4   ;;  %549 = vst.msk [vmem:[%s1040_s7 + $0x5] ss:$2 sm:$0x3] %vm1032_vm0, %v329_v9 }
  0x73   : > { %566 = dma.vmem_to_hbm [thread:$0]  (%p1168_p3), %s1037_s23, 128, %s1048_s15, %s337_s10, %s823_s5, %s823_s5, %s824_s18  }
  0x74   : > { %s342_s9 = scalar_lea.sflag [#allocation9], %s1014_s8  ;;  %s726_s21 = scalar_lea.vmem %s1057_s24, 128 }
  0x75   : > { %p727_p7 = scmp.ne.s32.totalorder %s1057_s24, %s726_s21  ;;  %s825_s28 = smov [#allocation8]  }
  0x76   : > { %s730_s11 = sshll.u32 %s825_s28, 4  ;;  %s731_s11 = int_to_ptr.vmem [resolvable:$false] %s730_s11 }
  0x77   : > { %p728_p10 = pnand %p727_p7, %p1168_p3  ;;  %s732_s19 = scalar_lea.vmem %s731_s11, 256 }
  0x78   : > { %p733_p11 = scmp.lt.s32.totalorder %s1057_s24, %s731_s11  ;;  %p734_p1 = scmp.lt.s32.totalorder %s732_s19, %s726_s21 }
  0x79   : > { %p729_p9 = pneg %p728_p10 }
  0x7a   : > { %p735_p6 = por %p734_p1, %p733_p11 }
  0x7c   : > { %p736_p2 = pnand %p735_p6, %p729_p9 }
  0x7e   : > { %739 = shalt.err (!%p736_p2)
}
  0x7f   : > { %s740_s23 = scalar_lea.hbm %s1067_s30, 128  ;;  %s744_s10 = scalar_lea.hbm %s1155_s3, 256 }
  0x80   : > { %p741_p5 = scmp.ne.s32.totalorder %s1067_s30, %s740_s23  ;;  %p745_p0 = scmp.lt.u32.totalorder %s1067_s30, %s1155_s3 }
  0x81   : > { %p746_p12 = scmp.lt.u32.totalorder %s744_s10, %s740_s23  ;;  %p748_p7 = scmp.lt.u32.totalorder %s740_s23, %s1067_s30 }
  0x82   : > { %p742_p4 = pnand %p741_p5, %p1168_p3 }
  0x83   : > { %p747_p13 = por %p746_p12, %p745_p0 }
  0x84   : > { %p743_p8 = pneg %p742_p4 }
  0x85   : > { %p749_p10 = por %p748_p7, %p747_p13 }
  0x87   : > { %p750_p9 = pnand %p749_p10, %p743_p8 }
  0x89   : > { %753 = shalt.err (!%p750_p9)
}
  0x8a   : > { %567 = dma.vmem_to_hbm [thread:$0]  (%p1168_p3), %s1057_s24, 128, %s1067_s30, %s342_s9, %s823_s5, %s823_s5, %s824_s18  }
  0x8b PF: > { %s390_s22 = sand.u32 1, %s796_s12   ;;  %p1169_p11 = scmp.ne.s32.totalorder %s1161_s27, 0 }
  0x8c   : > { %p1170_p1 = scmp.ge.s32.totalorder %s816_s17, 2  ;;  %s391_s29 = scalar_lea.sflag [#allocation4], %s390_s22 }
  0x8e   : > { %p578_p6 = pnand %p1170_p1, %p1169_p11 }
  0x90   : > { %787 = dma.done.wait (!%p578_p6), %s391_s29, 128  }
  0x91   : > { %789 = vsyncadd (!%p578_p6), %s391_s29, 4294967168  ;;  %s400_s25 = scalar_lea.sflag [#allocation9], %s390_s22 }
  0x92   : > { %791 = dma.done.wait (!%p578_p6), %s400_s25, 128  }
  0x93   : > { %793 = vsyncadd (!%p578_p6), %s400_s25, 4294967168  ;;  %s26_s17 = sadd.s32 1, %s816_s17   ;;  %s1171_s12 = smov %s800_s13 }
  0x94   : > { %p23_p2 = scmp.ge.s32.totalorder %s26_s17, 4   ;;  %s1172_s13 = smov %s804_s14 }
  0x95   : > { %s1173_s14 = smov %s902_s26  ;;  %s1174_s15 = smov %s812_s16 }
  0x96   : > { %s1175_s16 = smov %s1177_s20  ;;  %25 = sbr.rel (!%p23_p2) target bundleno = 10 (0xa), region = 111 }
  0x9d   :  { %405 = vsyncpa [#allocation3], 1 }
  0x9e   :  { %407 = vsyncpa [#allocation3 + $0x1], 1 }
  0x9f   :  { %408 = vsyncpa [#allocation6], 1 }
  0xa0   :  { %410 = vsyncpa [#allocation6 + $0x1], 1 }
  0xa1   :  { %411 = vsyncpa [#allocation4], 1 }
  0xa2   :  { %413 = vsyncpa [#allocation4 + $0x1], 1 }
  0xa3   :  { %414 = vsyncpa [#allocation9], 1 }
  0xa4   :  { %416 = vsyncpa [#allocation9 + $0x1], 1 }

</bundles_post_ra>
